<compile_context>
chip_gen: v6e
topology: v6e:2x2x1
jax: 0.10.0
libtpu: 0.0.40
codegen_flags: <defaults>
</compile_context>

<pallas_src>
import math
from functools import partial

import jax
import jax.numpy as jnp
from jax.experimental import pallas as pl
from jax.experimental.pallas import tpu as pltpu

F32 = jnp.float32
BF16 = jnp.bfloat16
VMEM_LIMIT = 48 * 1024 * 1024   # explicit scoped-VMEM limit for the big kernels


# ---------------------------------------------------------------------------
# small helpers
# ---------------------------------------------------------------------------

def _layernorm(v, eps=1e-5):
    v = v.astype(F32)
    mu = jnp.mean(v, axis=-1, keepdims=True)
    var = jnp.mean(jnp.square(v - mu), axis=-1, keepdims=True)
    return (v - mu) * jax.lax.rsqrt(var + eps)


def _zero_map(n):
    zeros = (0,) * n

    def im(i):
        return zeros
    return im


def _const_spec(shape):
    """Full-array block with a constant index map (fetched once)."""
    return pl.BlockSpec(shape, _zero_map(len(shape)))


def _frames_per_tile(T, B, target_rows=512):
    """Largest divisor of T whose row count (f*B) fits target_rows; prefer
    sublane-aligned (multiple-of-8) row counts."""
    # TODO(synk): for prime T this degenerates to 1 frame per tile; a ragged
    # last tile would need extra boundary handling in the halo logic.
    best, best_aligned = 1, 0
    for f in range(1, T + 1):
        if T % f != 0 or f * B > max(target_rows, B):
            continue
        best = f
        if (f * B) % 8 == 0:
            best_aligned = f
    return best_aligned if best_aligned else best


# ---------------------------------------------------------------------------
# Kernels
# ---------------------------------------------------------------------------

def linear_kernel(x_ref, w_ref, b_ref, o_ref):
    o_ref[...] = jnp.dot(x_ref[...], w_ref[...],
                         preferred_element_type=F32) + b_ref[...]


def ln_mm_kernel(x_ref, keep_ref, w_ref, b_ref, o_ref):
    """LayerNorm (affine folded into w/b) + 1x1 ConvTBC + padding mask."""
    n = _layernorm(x_ref[...]).astype(w_ref.dtype)
    y = jnp.dot(n, w_ref[...], preferred_element_type=F32) + b_ref[...]
    o_ref[...] = y * keep_ref[...]


def residual_block_kernel(x_ref, keep_ref, cv_ref, sk_ref, tp_ref,
                          gd_ref, bd_ref, w0_ref, w1_ref, w2_ref,
                          wc_ref, bgf_ref, wo_ref, bo_ref,
                          x_any, keep_any,
                          xo_ref, so_ref,
                          xlo_buf, xhi_buf, klo_buf, khi_buf, sems, *, B):
    """Fused ResidualBlock on one row tile (tile = Fb frames * B batches)."""
    i = pl.program_id(0)
    nt = pl.num_programs(0)
    N = x_any.shape[0]
    bn, H = x_ref.shape
    inv_sqrt2 = 0.7071067811865476

    # halo frames (+-1 time step = +-B rows) via small manual DMAs; offsets are
    # clamped in-bounds and the boundary frames are zeroed below.
    lo = jnp.maximum(i * bn - B, 0)
    hi = jnp.minimum((i + 1) * bn, N - B)
    cp_xlo = pltpu.make_async_copy(x_any.at[pl.ds(lo, B), :], xlo_buf, sems.at[0])
    cp_klo = pltpu.make_async_copy(keep_any.at[pl.ds(lo, B), :], klo_buf, sems.at[1])
    cp_xhi = pltpu.make_async_copy(x_any.at[pl.ds(hi, B), :], xhi_buf, sems.at[2])
    cp_khi = pltpu.make_async_copy(keep_any.at[pl.ds(hi, B), :], khi_buf, sems.at[3])
    cp_xlo.start(); cp_klo.start(); cp_xhi.start(); cp_khi.start()

    x = x_ref[...]
    keep = keep_ref[...]
    tp = tp_ref[...]
    gd = gd_ref[...]
    bd = bd_ref[...]

    # y = masked(x + t_proj(t)); LN of the dilated conv (explicit affine so the
    # zero conv-padding at sequence boundaries stays a literal zero row).
    ln = _layernorm((x + tp) * keep) * gd + bd                          # (bn,H)

    # conditioner projection + centre tap while halo DMAs are in flight.
    cn = _layernorm(cv_ref[...]).astype(BF16)
    acc = jnp.dot(cn, wc_ref[...], preferred_element_type=F32)
    acc = acc + jnp.dot(ln.astype(BF16), w1_ref[...], preferred_element_type=F32)

    tp_f = tp[:B]                                  # t-proj of one frame
    cp_xlo.wait(); cp_klo.wait()
    ln_lo = _layernorm((xlo_buf[...] + tp_f) * klo_buf[...]) * gd + bd
    ln_lo = ln_lo * jnp.where(i == 0, 0.0, 1.0)    # conv zero-padding at t == 0
    cp_xhi.wait(); cp_khi.wait()
    ln_hi = _layernorm((xhi_buf[...] + tp_f) * khi_buf[...]) * gd + bd
    ln_hi = ln_hi * jnp.where(i == nt - 1, 0.0, 1.0)

    # shifted +-1-frame views (sublane concat only; no lane-axis concat).
    # NOTE: when B % 8 != 0 the shifted slices cross sublane tiles (relayout).
    if bn > B:
        ln_m1 = jnp.concatenate([ln_lo, ln[:-B]], axis=0).astype(BF16)
        ln_p1 = jnp.concatenate([ln[B:], ln_hi], axis=0).astype(BF16)
    else:
        ln_m1 = ln_lo.astype(BF16)
        ln_p1 = ln_hi.astype(BF16)
    acc = acc + jnp.dot(ln_m1, w0_ref[...], preferred_element_type=F32)
    acc = acc + jnp.dot(ln_p1, w2_ref[...], preferred_element_type=F32)
    acc = acc + bgf_ref[...]

    g = acc[:, :H]
    f = acc[:, H:]
    y2 = jax.nn.sigmoid(g) * jnp.tanh(f) * keep

    on = _layernorm(y2).astype(BF16)
    out = jnp.dot(on, wo_ref[...], preferred_element_type=F32) + bo_ref[...]
    res = out[:, :H] * keep
    skp = out[:, H:] * keep

    xo_ref[...] = (x + res) * inv_sqrt2
    so_ref[...] = (sk_ref[...] + skp) * keep


def cross_film_kernel(x_ref, keep_ref, mask_ref, kh_ref, vh_ref, wq_ref, wo_ref,
                      wf_ref, bfw_ref, o_ref, *, n_heads, scale):
    """Fused cross-attention (x attends over per-batch prompt latents) + FiLM.

    Rows are time-major (frame, batch); the per-batch key restriction is an
    additive block-diagonal mask so all matmuls stay 2-D and lane-dense.
    """
    x = x_ref[...]                                    # (bn, H) f32
    H = x.shape[-1]
    keep = keep_ref[...]
    mask = mask_ref[...]                              # (bn, B*n_lat) additive bias
    xb = x.astype(BF16)

    ctx = jnp.zeros(x.shape, F32)
    for h in range(n_heads):                          # static unroll, per-head slabs
        q = jnp.dot(xb, wq_ref[h], preferred_element_type=F32) * scale   # (bn,Dh)
        s = jax.lax.dot_general(q.astype(BF16), kh_ref[h],
                                (((1,), (1,)), ((), ())),
                                preferred_element_type=F32) + mask       # (bn,B*n_lat)
        m = jnp.max(s, axis=-1, keepdims=True)
        e = jnp.exp(s - m)
        p = (e / jnp.sum(e, axis=-1, keepdims=True)).astype(BF16)
        c = jnp.dot(p, vh_ref[h], preferred_element_type=F32)            # (bn,Dh)
        ctx = ctx + jnp.dot(c.astype(BF16), wo_ref[h],
                            preferred_element_type=F32)                  # (bn,H)

    # FiLM epilogue fused in (LN affine folded into wf/bfw).
    ss = jnp.dot(_layernorm(ctx).astype(BF16), wf_ref[...],
                 preferred_element_type=F32) + bfw_ref[...]
    o_ref[...] = (x * ss[:, :H] + ss[:, H:]) * keep


def resampler_kernel(lat_ref, kv_ref, bias_ref, wq_ref, wk_ref, wv_ref, wo_ref,
                     o_ref, *, n_heads, scale):
    """Perceiver resampler MHA (latents attend over the prompt) + residual."""
    xq = lat_ref[...]                                 # (n_lat, H)
    xkv = kv_ref[0]                                   # (Tp, H)
    bias = bias_ref[0]                                # (1, Tp) key-padding bias
    xqb = xq.astype(BF16)
    xkb = xkv.astype(BF16)

    out = jnp.zeros(xq.shape, F32)
    for h in range(n_heads):
        q = jnp.dot(xqb, wq_ref[h], preferred_element_type=F32) * scale
        k = jnp.dot(xkb, wk_ref[h], preferred_element_type=F32)
        v = jnp.dot(xkb, wv_ref[h], preferred_element_type=F32)
        s = jax.lax.dot_general(q.astype(BF16), k.astype(BF16),
                                (((1,), (1,)), ((), ())),
                                preferred_element_type=F32) + bias
        m = jnp.max(s, axis=-1, keepdims=True)
        e = jnp.exp(s - m)
        p = (e / jnp.sum(e, axis=-1, keepdims=True)).astype(BF16)
        c = jnp.dot(p, v.astype(BF16), preferred_element_type=F32)
        out = out + jnp.dot(c.astype(BF16), wo_ref[h], preferred_element_type=F32)
    o_ref[0] = out + xq


def skip_head_kernel(sk_ref, keep_ref, w1_ref, b1_ref, w2_ref, b2_ref, o_ref,
                     *, inv_sqrt_nl):
    """skip/sqrt(nl) -> skip_conv -> mask -> relu -> proj -> mask (one pass)."""
    keep = keep_ref[...]
    # The 1/sqrt(n_layers) multiply is kept for exact parity with PyTorch
    # (LayerNorm is only scale-invariant up to its eps term); it is one VPU mul
    # hidden under the matmuls.
    x = sk_ref[...] * inv_sqrt_nl
    h = jnp.dot(_layernorm(x).astype(BF16), w1_ref[...],
                preferred_element_type=F32) + b1_ref[...]
    h = jnp.maximum(h, 0.0) * keep
    o = jnp.dot(_layernorm(h).astype(BF16), w2_ref[...],
                preferred_element_type=F32) + b2_ref[...]
    o_ref[...] = o * keep


# ---------------------------------------------------------------------------
# Wrappers around pallas_call
# ---------------------------------------------------------------------------

def pallas_linear(x, w, b):
    return pl.pallas_call(
        linear_kernel,
        out_shape=jax.ShapeDtypeStruct((x.shape[0], w.shape[1]), F32),
    )(x, w, b)


def ln_conv1x1(x2, w, b, keep2, *, block_rows=512):
    """Row-tiled LayerNorm + 1x1 ConvTBC (LN affine folded) + mask.
    block_rows can be raised to 1024-2048 on v6e (128 MiB VMEM)."""
    N, Cin = x2.shape
    Cout = w.shape[1]
    bn = N if N <= block_rows else block_rows
    return pl.pallas_call(
        ln_mm_kernel,
        grid=(pl.cdiv(N, bn),),
        in_specs=[pl.BlockSpec((bn, Cin), lambda i: (i, 0)),
                  pl.BlockSpec((bn, 1), lambda i: (i, 0)),
                  _const_spec((Cin, Cout)),
                  _const_spec((1, Cout))],
        out_specs=pl.BlockSpec((bn, Cout), lambda i: (i, 0)),
        out_shape=jax.ShapeDtypeStruct((N, Cout), F32),
        compiler_params=pltpu.CompilerParams(dimension_semantics=("parallel",)),
    )(x2, keep2, w, b)


def residual_block(x2, skip2, cv2, tp_tile, keep2, rp, *, B, Fb):
    N, H = x2.shape
    bn = Fb * B
    nt = N // bn
    spec_x = pl.BlockSpec((bn, H), lambda i: (i, 0))
    spec_k = pl.BlockSpec((bn, 1), lambda i: (i, 0))
    xo, so = pl.pallas_call(
        partial(residual_block_kernel, B=B),
        grid=(nt,),
        in_specs=[spec_x, spec_k, spec_x, spec_x, _const_spec((bn, H)),
                  _const_spec((1, H)), _const_spec((1, H)),
                  _const_spec((H, 2 * H)), _const_spec((H, 2 * H)),
                  _const_spec((H, 2 * H)), _const_spec((H, 2 * H)),
                  _const_spec((1, 2 * H)),
                  _const_spec((H, 2 * H)), _const_spec((1, 2 * H)),
                  pl.BlockSpec(memory_space=pl.ANY),
                  pl.BlockSpec(memory_space=pl.ANY)],
        out_specs=(spec_x, spec_x),
        out_shape=(jax.ShapeDtypeStruct((N, H), F32),
                   jax.ShapeDtypeStruct((N, H), F32)),
        scratch_shapes=[pltpu.VMEM((B, H), F32), pltpu.VMEM((B, H), F32),
                        pltpu.VMEM((B, 1), F32), pltpu.VMEM((B, 1), F32),
                        pltpu.SemaphoreType.DMA((4,))],
        compiler_params=pltpu.CompilerParams(
            dimension_semantics=("parallel",),
            vmem_limit_bytes=VMEM_LIMIT),
    )(x2, keep2, cv2, skip2, tp_tile,
      rp['gd'], rp['bd'], rp['w0'], rp['w1'], rp['w2'],
      rp['wc'], rp['bgf'], rp['wo'], rp['bo'],
      x2, keep2)
    return xo, so


def cross_attn_film(x2, keep2, attn_mask, kh, vh, cp, *, B, Fb, n_heads):
    N, H = x2.shape
    bn = Fb * B
    nt = N // bn
    Dh = H // n_heads
    BL = kh.shape[1]                      # B * n_lat
    scale = 1.0 / math.sqrt(Dh)
    spec_x = pl.BlockSpec((bn, H), lambda i: (i, 0))
    spec_k = pl.BlockSpec((bn, 1), lambda i: (i, 0))
    return pl.pallas_call(
        partial(cross_film_kernel, n_heads=n_heads, scale=scale),
        grid=(nt,),
        in_specs=[spec_x, spec_k,
                  _const_spec((bn, BL)),
                  _const_spec((n_heads, BL, Dh)), _const_spec((n_heads, BL, Dh)),
                  _const_spec((n_heads, H, Dh)), _const_spec((n_heads, Dh, H)),
                  _const_spec((H, 2 * H)), _const_spec((1, 2 * H))],
        out_specs=spec_x,
        out_shape=jax.ShapeDtypeStruct((N, H), F32),
        compiler_params=pltpu.CompilerParams(
            dimension_semantics=("parallel",),
            vmem_limit_bytes=VMEM_LIMIT),
    )(x2, keep2, attn_mask, kh, vh, cp['wq'], cp['wo'], cp['wf'], cp['bf'])


def perceiver_resampler(latents, prompt_b, bias_b, p, *, n_heads):
    B, Tp, H = prompt_b.shape
    n_lat = latents.shape[0]
    Dh = H // n_heads
    scale = 1.0 / math.sqrt(Dh)
    return pl.pallas_call(
        partial(resampler_kernel, n_heads=n_heads, scale=scale),
        grid=(B,),
        in_specs=[_const_spec((n_lat, H)),
                  pl.BlockSpec((1, Tp, H), lambda b: (b, 0, 0)),
                  pl.BlockSpec((1, 1, Tp), lambda b: (b, 0, 0)),
                  _const_spec((n_heads, H, Dh)), _const_spec((n_heads, H, Dh)),
                  _const_spec((n_heads, H, Dh)), _const_spec((n_heads, Dh, H))],
        out_specs=pl.BlockSpec((1, n_lat, H), lambda b: (b, 0, 0)),
        out_shape=jax.ShapeDtypeStruct((B, n_lat, H), F32),
        compiler_params=pltpu.CompilerParams(dimension_semantics=("parallel",)),
    )(latents, prompt_b, bias_b, p['wq'], p['wk'], p['wv'], p['wo'])


def skip_head(skip2, keep2, p1, p2, n_layers, *, block_rows=512):
    N, H = skip2.shape
    Cout = p2['w'].shape[1]
    bn = N if N <= block_rows else block_rows
    return pl.pallas_call(
        partial(skip_head_kernel, inv_sqrt_nl=1.0 / math.sqrt(n_layers)),
        grid=(pl.cdiv(N, bn),),
        in_specs=[pl.BlockSpec((bn, H), lambda i: (i, 0)),
                  pl.BlockSpec((bn, 1), lambda i: (i, 0)),
                  _const_spec((H, H)), _const_spec((1, H)),
                  _const_spec((H, Cout)), _const_spec((1, Cout))],
        out_specs=pl.BlockSpec((bn, Cout), lambda i: (i, 0)),
        out_shape=jax.ShapeDtypeStruct((N, Cout), F32),
        compiler_params=pltpu.CompilerParams(dimension_semantics=("parallel",)),
    )(skip2, keep2, p1['w'], p1['b'], p2['w'], p2['b'])


# ---------------------------------------------------------------------------
# Glue (pure JAX): sinusoidal time embedding, masks, layer wiring
# ---------------------------------------------------------------------------

def sinusoidal_pos_emb(t, dim):
    half = dim // 2
    emb = math.log(10000.0) / (half - 1)
    freqs = jnp.exp(jnp.arange(half, dtype=F32) * -emb)
    a = t.astype(F32)[:, None] * freqs[None, :]
    return jnp.concatenate([jnp.sin(a), jnp.cos(a)], axis=-1)


def diffusion_encoder_forward(kp, x_bct, contentvec, prompt,
                              contentvec_lengths, prompt_lengths, t, cfg):
    B, Cin, T = x_bct.shape
    H = cfg['hidden']
    nl = cfg['n_layers']
    nh = cfg['n_heads']
    n_lat = cfg['num_latents']
    N = T * B
    Fb = _frames_per_tile(T, B)

    x2 = jnp.transpose(x_bct, (2, 0, 1)).reshape(N, Cin).astype(F32)
    cv2 = contentvec.astype(F32).reshape(N, H)

    # ----- time embedding MLP (Sinusoidal -> Linear -> GELU -> Linear) -----
    temb = sinusoidal_pos_emb(t, H)
    hmid = pallas_linear(temb, kp['time_w1'], kp['time_b1'])
    hmid = jax.nn.gelu(hmid, approximate=False)   # TODO(synk): exact-erf GELU kept in XLA
    temb = pallas_linear(hmid, kp['time_w2'], kp['time_b2'])          # (B, H)
    ones_b = jnp.ones((B, 1), F32)
    tp_all = ln_conv1x1(temb, kp['t_all_w'], kp['t_all_b'], ones_b)   # (B, nl*H)

    # ----- padding masks (keep = 1 - padding), time-major -----
    keep2 = (jnp.arange(T)[:, None] < contentvec_lengths[None, :]).astype(F32).reshape(N, 1)
    Tp = prompt.shape[0]
    pr_bias = jnp.where(jnp.arange(Tp)[None, :] >= prompt_lengths[:, None],
                        -1e9, 0.0).astype(F32)[:, None, :]            # (B,1,Tp)

    # ----- Perceiver resampler: latents attend over the prompt (+ residual) -----
    prompt_b = jnp.transpose(prompt.astype(F32), (1, 0, 2))           # small, one-time
    lat = perceiver_resampler(kp['latents'], prompt_b, pr_bias, kp['res_attn'],
                              n_heads=cfg['resampler_heads'])          # (B, n_lat, H)
    lat2 = lat.reshape(B * n_lat, H)
    ones_lat = jnp.ones((B * n_lat, 1), F32)

    # block-diagonal additive mask (tile rows interleave batches with period B)
    row_b = jnp.tile(jnp.arange(B), Fb)
    col_b = jnp.repeat(jnp.arange(B), n_lat)
    attn_mask = jnp.where(row_b[:, None] == col_b[None, :], 0.0, -1e9).astype(F32)

    # ----- pre conv -----
    x2 = ln_conv1x1(x2, kp['pre_conv']['w'], kp['pre_conv']['b'], keep2)

    skip2 = jnp.zeros((N, H), F32)
    Dh = H // nh
    for lid in range(nl):
        # one (tile,H) slab per layer instead of an (N,H) broadcast
        tp_tile = jnp.tile(tp_all[:, lid * H:(lid + 1) * H], (Fb, 1))
        x2, skip2 = residual_block(x2, skip2, cv2, tp_tile, keep2,
                                   kp['res'][lid], B=B, Fb=Fb)
        if lid % 3 == 2:
            j = (lid + 1) // 3 - 1
            # prompt_proj folded into the K/V projections of the cross-attn
            kv_all = ln_conv1x1(lat2, kp['kv_proj'][j]['w'],
                                kp['kv_proj'][j]['b'], ones_lat)       # (B*n_lat, 2H)
            kh = kv_all[:, :H].reshape(B * n_lat, nh, Dh).transpose(1, 0, 2).astype(BF16)
            vh = kv_all[:, H:].reshape(B * n_lat, nh, Dh).transpose(1, 0, 2).astype(BF16)
            x2 = cross_attn_film(x2, keep2, attn_mask, kh, vh, kp['cross'][j],
                                 B=B, Fb=Fb, n_heads=nh)

    out2 = skip_head(skip2, keep2, kp['skip_conv'], kp['proj'], nl)    # (N, Cout)
    return out2.reshape(T, B, -1).transpose(1, 2, 0)                   # (B, Cout, T)


# ---------------------------------------------------------------------------
# Deterministic "torch-style" parameter init + kernel-friendly packing
# ---------------------------------------------------------------------------

def conv_layer_params(key, c_in, c_out, K, dropout=0.0):
    std = math.sqrt(4.0 * (1.0 - dropout) / (K * c_in))
    w = std * jax.random.normal(key, (K, c_in, c_out), dtype=F32)
    return dict(gamma=jnp.ones((1, c_in), F32), beta=jnp.zeros((1, c_in), F32),
                w=w, bias=jnp.zeros((1, c_out), F32))


def init_mha(key, dim):
    k1, k2 = jax.random.split(key)
    return dict(in_proj=jax.random.normal(k1, (3 * dim, dim), F32) / math.sqrt(dim),
                out_proj=jax.random.normal(k2, (dim, dim), F32) / math.sqrt(dim))


def init_params(key, cfg):
    Cin, Cout = cfg['in_channels'], cfg['out_channels']
    H, K = cfg['hidden'], cfg['kernel_size']
    nl = cfg['n_layers']
    n_film = nl // 3
    keys = iter(jax.random.split(key, 16 + 4 * nl + 3 * n_film))

    def nk():
        return next(keys)

    params = {}
    params['pre_conv'] = conv_layer_params(nk(), Cin, H, 1)
    params['time_w1'] = jax.random.normal(nk(), (H, 4 * H), F32) / math.sqrt(H)
    params['time_b1'] = jnp.zeros((1, 4 * H), F32)
    params['time_w2'] = jax.random.normal(nk(), (4 * H, H), F32) / math.sqrt(4 * H)
    params['time_b2'] = jnp.zeros((1, H), F32)
    params['latents'] = (math.sqrt(4 * (1.0 - 0.2) / H)
                         * jax.random.normal(nk(), (cfg['num_latents'], H), F32))
    params['res_attn'] = init_mha(nk(), H)
    params['skip_conv'] = conv_layer_params(nk(), H, H, 1)
    params['proj'] = conv_layer_params(nk(), H, Cout, 1)
    params['res'] = [dict(t_proj=conv_layer_params(nk(), H, H, 1),
                          cond_proj=conv_layer_params(nk(), H, 2 * H, 1),
                          dilated=conv_layer_params(nk(), H, 2 * H, K),
                          out_proj=conv_layer_params(nk(), H, 2 * H, 1))
                     for _ in range(nl)]
    params['cross_attn'] = [init_mha(nk(), H) for _ in range(n_film)]
    params['film'] = [conv_layer_params(nk(), H, 2 * H, 1) for _ in range(n_film)]
    params['prompt_proj'] = [conv_layer_params(nk(), H, H, 1) for _ in range(n_film)]
    return params


def fold_1x1(p):
    """Fold LayerNorm affine of a 1x1 ConvLayer into the conv weight/bias."""
    w = p['w'][0]
    gamma = p['gamma'][0]
    return {'w': w * gamma[:, None], 'b': p['beta'] @ w + p['bias']}


def prep_mha_heads(p, n_heads):
    E = p['out_proj'].shape[0]
    Dh = E // n_heads

    def split_in(w):      # torch applies x @ w.T ; split columns per head
        return jnp.transpose(w.T.reshape(E, n_heads, Dh), (1, 0, 2)).astype(BF16)

    ip = p['in_proj']
    return {'wq': split_in(ip[:E]),
            'wk': split_in(ip[E:2 * E]),
            'wv': split_in(ip[2 * E:]),
            'wo': p['out_proj'].T.reshape(n_heads, Dh, E).astype(BF16)}


def prep_residual(p):
    d = p['dilated']
    cond = fold_1x1(p['cond_proj'])
    outp = fold_1x1(p['out_proj'])
    return {'gd': d['gamma'], 'bd': d['beta'],
            'w0': d['w'][0].astype(BF16), 'w1': d['w'][1].astype(BF16),
            'w2': d['w'][2].astype(BF16),
            'wc': cond['w'].astype(BF16),
            'bgf': d['bias'] + cond['b'],
            'wo': outp['w'].astype(BF16), 'bo': outp['b']}


def prep_cross(attn_p, film_p, prompt_p, n_heads):
    E = attn_p['out_proj'].shape[0]
    mh = prep_mha_heads(attn_p, n_heads)
    filmf = fold_1x1(film_p)
    pf = fold_1x1(prompt_p)
    ip = attn_p['in_proj']
    wkv = jnp.concatenate([ip[E:2 * E].T, ip[2 * E:].T], axis=1)      # (E, 2E)
    cross = {'wq': mh['wq'], 'wo': mh['wo'],
             'wf': filmf['w'].astype(BF16), 'bf': filmf['b']}
    kv = {'w': (pf['w'] @ wkv).astype(BF16), 'b': pf['b'] @ wkv}      # prompt_proj folded in
    return cross, kv


def prep_params(raw, cfg):
    nh = cfg['n_heads']
    H = cfg['hidden']
    tall_w, tall_b = [], []
    for lp in raw['res']:
        f = fold_1x1(lp['t_proj'])
        tall_w.append(f['w'])
        tall_b.append(f['b'])
    pre = fold_1x1(raw['pre_conv'])
    skc = fold_1x1(raw['skip_conv'])
    prj = fold_1x1(raw['proj'])
    cross, kvproj = [], []
    for j in range(cfg['n_layers'] // 3):
        c, kv = prep_cross(raw['cross_attn'][j], raw['film'][j],
                           raw['prompt_proj'][j], nh)
        cross.append(c)
        kvproj.append(kv)
    return {
        'pre_conv': {'w': pre['w'].astype(BF16), 'b': pre['b']},
        'skip_conv': {'w': skc['w'].astype(BF16), 'b': skc['b']},
        'proj': {'w': prj['w'].astype(BF16), 'b': prj['b']},
        'time_w1': raw['time_w1'], 'time_b1': raw['time_b1'],
        'time_w2': raw['time_w2'], 'time_b2': raw['time_b2'],
        'latents': raw['latents'],
        'res_attn': prep_mha_heads(raw['res_attn'], cfg['resampler_heads']),
        't_all_w': jnp.concatenate(tall_w, axis=1).astype(BF16),
        't_all_b': jnp.concatenate(tall_b, axis=1),
        'res': [prep_residual(lp) for lp in raw['res']],
        'cross': cross,
        'kv_proj': kvproj,
    }


# ---------------------------------------------------------------------------

if __name__ == "__main__":
    cfg = dict(in_channels=16, out_channels=16, hidden=32, kernel_size=3,
               n_layers=6, n_heads=4, num_latents=32, resampler_heads=8)
    B, T, Tp = 2, 8, 8

    root = jax.random.PRNGKey(0)
    kparam, kx, kc, kpr = jax.random.split(root, 4)
    raw_params = init_params(kparam, cfg)
    params = prep_params(raw_params, cfg)

    x = jax.random.normal(kx, (B, cfg['in_channels'], T), F32)
    contentvec = jax.random.normal(kc, (T, B, cfg['hidden']), F32)
    prompt = jax.random.normal(kpr, (Tp, B, cfg['hidden']), F32)
    contentvec_lengths = jnp.array([8, 6], jnp.int32)
    prompt_lengths = jnp.array([8, 5], jnp.int32)
    t = jnp.array([0.5, 3.0], F32)

    out = diffusion_encoder_forward(params, x, contentvec, prompt,
                                    contentvec_lengths, prompt_lengths, t, cfg)
    out = jax.block_until_ready(out)
    assert out.shape == (B, cfg['out_channels'], T), out.shape
    assert not bool(jnp.isnan(out).any())
    print("KERNEL_OK")
</pallas_src>

<mosaic_0001>
module attributes {stable_mosaic.version = 11 : i64} {
  func.func @linear_kernel(%arg0: memref<2x32xf32, #tpu.memory_space<vmem>>, %arg1: memref<32x128xf32, #tpu.memory_space<vmem>>, %arg2: memref<1x128xf32, #tpu.memory_space<vmem>>, %arg3: memref<2x128xf32, #tpu.memory_space<vmem>>) attributes {dimension_semantics = [], scalar_prefetch = 0 : i64, scratch_operands = 0 : i64, tpu.core_type = #tpu.core_type<tc>} {
    %c0 = arith.constant 0 : index
    %c0_0 = arith.constant 0 : index
    %0 = vector.load %arg0[%c0, %c0_0] : memref<2x32xf32, #tpu.memory_space<vmem>>, vector<2x32xf32>
    %c0_1 = arith.constant 0 : index
    %c0_2 = arith.constant 0 : index
    %1 = vector.load %arg1[%c0_1, %c0_2] : memref<32x128xf32, #tpu.memory_space<vmem>>, vector<32x128xf32>
    %cst = arith.constant dense<0.000000e+00> : vector<2x128xf32>
    %2 = tpu.matmul %0, %1, %cst {dimension_numbers = #tpu.dot_dimension_numbers<[1], [0], [0], [1], [0, 0, 1, 1], [], []>} : vector<2x32xf32>, vector<32x128xf32>, vector<2x128xf32> -> vector<2x128xf32>
    %c0_3 = arith.constant 0 : index
    %c0_4 = arith.constant 0 : index
    %3 = vector.load %arg2[%c0_3, %c0_4] : memref<1x128xf32, #tpu.memory_space<vmem>>, vector<1x128xf32>
    %4 = vector.broadcast %3 : vector<1x128xf32> to vector<2x128xf32>
    %5 = arith.addf %2, %4 : vector<2x128xf32>
    %c0_5 = arith.constant 0 : index
    %c0_6 = arith.constant 0 : index
    %6 = vector.load %arg3[%c0_5, %c0_6] : memref<2x128xf32, #tpu.memory_space<vmem>>, vector<2x128xf32>
    tpu.vector_store %arg3[%c0_5, %c0_6], %5 {strides = array<i32>} : memref<2x128xf32, #tpu.memory_space<vmem>>, vector<2x128xf32>,
    return
  }
}

</mosaic_0001>

<bundles_post_ra>
// kernel: tpu_custom_call.1
= control target key start
LH: loop header
LB: loop body
LE: loop exit
PB: predicated region body
PF: predicated region fallthrough
CT: control target
= control target key end

     0   :  { %8 = vsyncpa [#allocation3], 0  ;;  %s274_s0 = inlined_call_operand.hbm [shape: f32[2,32], index: 0, kind: input, shape index: {}]   ;;  %s275_s1 = inlined_call_operand.hbm [shape: f32[32,128], index: 1, kind: input, shape index: {}]   ;;  %s276_s2 = inlined_call_operand.vmem [shape: f32[1,128], index: 2, kind: input, shape index: {}]   ;;  %s277_s3 = inlined_call_operand.hbm [shape: f32[2,128], index: 3, kind: output, shape index: {}]  }
   0x1   :  { %9 = vsyncpa [#allocation6], 0 }
   0x2   :  { %10 = vsyncpa [#allocation4], 0  ;;  %s235_s12 = smov [#allocation2]   ;;  %s236_s14 = smov [#allocation5]  }
   0x3   :  { %s17_s13 = sshll.u32 %s235_s12, 4  ;;  %s26_s15 = sshll.u32 %s236_s14, 4  ;;  %s18_s13 = int_to_ptr.vmem [resolvable:$true] %s17_s13  ;;  %s27_s15 = int_to_ptr.vmem [resolvable:$true] %s26_s15 }
   0x4   :  { %s177_s16 = scalar_lea.vmem %s18_s13, 32  ;;  %p182_p1 = scmp.lt.s32.totalorder %s18_s13, %s18_s13 }
   0x5   :  { %p178_p0 = scmp.ne.s32.totalorder %s18_s13, %s177_s16  ;;  %p183_p2 = scmp.lt.s32.totalorder %s177_s16, %s177_s16 }
   0x7   :  { %p184_p3 = por %p183_p2, %p182_p1 }
   0x9   :  { %p185_p4 = pnand %p184_p3, %p178_p0 }
   0xb   :  { %188 = shalt.err (!%p185_p4)
}
   0xc   :  { %20 = dma.hbm_to_vmem [thread:$0]  %s274_s0, 32, %s18_s13, [#allocation3]  }
   0xd   :  { %s197_s19 = scalar_lea.vmem %s27_s15, 512  ;;  %p202_p6 = scmp.lt.s32.totalorder %s27_s15, %s27_s15 }
   0xe   :  { %p198_p5 = scmp.ne.s32.totalorder %s27_s15, %s197_s19  ;;  %p203_p7 = scmp.lt.s32.totalorder %s197_s19, %s197_s19 }
  0x10   :  { %p204_p8 = por %p203_p7, %p202_p6 }
  0x12   :  { %p205_p9 = pnand %p204_p8, %p198_p5 }
  0x14   :  { %208 = shalt.err (!%p205_p9)
}
  0x15   :  { %s237_s20 = smov 128   ;;  %s238_s21 = smov 8  }
  0x16   :  { %32 = dma.hbm_to_vmem [thread:$0]  %s275_s1, 512, %s27_s15, [#allocation6], %s237_s20, %s237_s20, %s238_s21  }
  0x17   :  { %229 = dma.done.wait [#allocation3], 32  }
  0x18   :  { %230 = vsyncadd [#allocation3], 4294967264 }
  0x19   :  { %231 = dma.done.wait [#allocation6], 512  }
  0x1a   :  { %232 = vsyncadd [#allocation6], 4294966784  ;;  %v239_v0 = vmov 0.0   ;;  %vm240_vm0 = vmmov 0   ;;  %v45_v1 = vld [vmem:[#allocation5 + $0x18] sm:$0xff]  ;;  %v44_v2 = vld [vmem:[#allocation5 + $0x10] sm:$0xff] }
  0x1b   :  { %151 = vmatprep.subr.mxu0 %v239_v0  ;;  %159 = vmatprep.mubr.msk.f32.mxu0 %vm240_vm0, %v239_v0  ;;  %v43_v3 = vld [vmem:[#allocation5 + $0x8] sm:$0xff]  ;;  %v42_v4 = vld [vmem:[#allocation5] sm:$0xff]  ;;  %v41_v5 = vld [vmem:[#allocation2] sm:$0x3]  ;;  %vm53_vm1 = vcmask 261120   ;;  %s241_s24 = smov [#allocation7]  }
  0x1c   :  { %152 = vmatpush3.msra.mxu0 %v45_v1  ;;  %v144_v6 = vld [vmem:[%s276_s2] ss:$0 sm:$0xff]  ;;  %s134_s25 = sshll.u32 %s241_s24, 4  ;;  %s135_s25 = int_to_ptr.vmem [resolvable:$true] %s134_s25 }
  0x1d   :  { %153 = vmatprep.subr.mxu0 %v239_v0  ;;  %s209_s26 = scalar_lea.vmem %s135_s25, 32  ;;  %p214_p11 = scmp.lt.s32.totalorder %s135_s25, %s135_s25 }
  0x1e   :  { %154 = vmatpush3.msra.mxu0 %v44_v2  ;;  %p210_p10 = scmp.ne.s32.totalorder %s135_s25, %s209_s26  ;;  %p215_p12 = scmp.lt.s32.totalorder %s209_s26, %s209_s26 }
  0x1f   :  { %155 = vmatprep.subr.mxu0 %v239_v0 }
  0x20   :  { %156 = vmatpush3.msra.mxu0 %v43_v3  ;;  %p216_p13 = por %p215_p12, %p214_p11 }
  0x21   :  { %157 = vmatprep.subr.mxu0 %v239_v0 }
  0x22   :  { %158 = vmatpush3.msra.mxu0 %v42_v4  ;;  %p217_p0 = pnand %p216_p13, %p210_p10 }
  0x23   :  { %160 = vmatmul.mubr.msk.f32.vlgmr.msra.gmra.mxu0 %vm53_vm1, %v41_v5 }
  0xe3   :  { %v123_v7 = vpop.f32.mrf.mxu0 }
  0xe4   :  { %v124_v8 = vadd.f32 %v144_v6, %v123_v7 }
  0xe5   :  { %v161_v9 = vpop.f32.mrf.mxu0 }
  0xe6   :  { %127 = vst [vmem:[#allocation7] sm:$0x3] %v124_v8 }
  0xe7   :  { %220 = shalt.err (!%p217_p0)
}
  0xe8   :  { %137 = dma.vmem_to_hbm [thread:$0]  %s135_s25, 32, %s277_s3, [#allocation4]  }
  0xe9   :  { %233 = dma.done.wait [#allocation4], 32  }
  0xea   :  { %234 = vsyncadd [#allocation4], 4294967264 }
  0xeb   :  { %141 = vsyncpa [#allocation3], 1 }
  0xec   :  { %142 = vsyncpa [#allocation6], 1 }
  0xed   :  { %143 = vsyncpa [#allocation4], 1 }

</bundles_post_ra>
